<compile_context>
chip_gen: v7x
topology: tpu7x:2x2x1
jax: 0.10.0
libtpu: 0.0.40
codegen_flags: <defaults>
</compile_context>

<pallas_src>
import functools

import jax
import jax.numpy as jnp
from jax.experimental import pallas as pl
from jax.experimental.pallas import tpu as pltpu


def _round_up(x, m):
    return ((x + m - 1) // m) * m


def _gcn_kernel(adj_ref, emb_ref, o_ref, acc_ref, *, negative_slope, tk,
                emb_resident):
    k = pl.program_id(2)

    # Zero the accumulator at the first K step of every (i, j) tile.
    @pl.when(k == 0)
    def _():
        acc_ref[...] = jnp.zeros_like(acc_ref)

    # adj arrives as bf16 (exact for small-integer adjacency values); cast up
    # in-register so accumulation matches the f32 reference.
    a = adj_ref[...].astype(jnp.float32)

    if emb_resident:
        # Whole (Kp, tn) embeds panel is VMEM-resident; slice the current
        # reduction chunk.  Offset is a multiple of tk (>= 128).
        off = pl.multiple_of(k * tk, tk)
        e = emb_ref[pl.ds(off, tk), :]
    else:
        e = emb_ref[...]

    acc_ref[...] += jnp.dot(a, e.astype(jnp.float32),
                            preferred_element_type=jnp.float32)

    # Fused LeakyReLU epilogue + single lane-dense store at the last K step.
    @pl.when(k == pl.num_programs(2) - 1)
    def _():
        z = acc_ref[...]
        o_ref[...] = jnp.where(z >= 0, z, negative_slope * z).astype(o_ref.dtype)


def gcn_layer(adj, embeds, *, negative_slope=0.1, tm=None, tn=None, tk=None,
              adj_dtype=jnp.bfloat16, emb_resident_bytes=8 << 20):
    """out = leaky_relu(adj @ embeds, negative_slope).

    adj:    (N, K) dense(ified) adjacency
    embeds: (K, D) node features
    """
    N, K = adj.shape
    K2, D = embeds.shape
    assert K == K2, "adj / embeds inner dims must match"

    out_dtype = embeds.dtype

    # --- tile selection --------------------------------------------------
    # Feature tile: whole padded feature dim, capped at 512 -> the j grid axis
    # usually collapses to 1 and adj is read from HBM exactly once.
    Dp = _round_up(D, 128)
    if tn is None:
        tn = min(Dp, 512)
    Dp = _round_up(Dp, tn)

    # Row panels: big enough to amortize per-grid-step overhead, but keep at
    # least two panels so both v7x TensorCores get work on the parallel axis.
    Mp0 = _round_up(N, 8)
    if tm is None:
        tm = max(8, min(256, _round_up(max(Mp0 // 2, 8), 8)))
    Mp = _round_up(N, tm)

    # Reduction tiles (must stay 128-aligned on the adj lane dim).
    Kp0 = _round_up(K, 128)
    if tk is None:
        tk = min(1024, Kp0)
    Kp = _round_up(K, tk)

    # adj -> bf16 is exact for adjacency values (0/1/2/...); halves the
    # dominant N^2 HBM stream.  Embeds keep their input precision.
    adj_c = adj.astype(adj_dtype)
    emb_c = embeds
    if (Mp, Kp) != (N, K):
        adj_c = jnp.pad(adj_c, ((0, Mp - N), (0, Kp - K)))
    if (Kp, Dp) != (K, D):
        emb_c = jnp.pad(emb_c, ((0, Kp - K), (0, Dp - D)))

    emb_itemsize = jnp.dtype(emb_c.dtype).itemsize
    emb_resident = (Kp * tn * emb_itemsize) <= emb_resident_bytes

    if emb_resident:
        # Whole K extent in one block; index_map constant in i and k so the
        # panel is DMA'd once and reused across every row panel / K step.
        emb_spec = pl.BlockSpec((Kp, tn), lambda i, j, k: (0, j))
        emb_block_bytes = Kp * tn * emb_itemsize
    else:
        emb_spec = pl.BlockSpec((tk, tn), lambda i, j, k: (k, j))
        emb_block_bytes = tk * tn * emb_itemsize

    # VMEM budget (double-buffered inputs/outputs + f32 accumulator), capped
    # so the same config is valid on v7x (64 MiB physical) and v5e/v6e.
    adj_block_bytes = tm * tk * jnp.dtype(adj_dtype).itemsize
    out_block_bytes = tm * tn * jnp.dtype(out_dtype).itemsize
    acc_bytes = tm * tn * 4
    vmem_needed = 2 * (adj_block_bytes + emb_block_bytes + out_block_bytes) + acc_bytes
    vmem_limit = int(min(max(2 * vmem_needed, 32 << 20), 48 << 20))

    grid = (Mp // tm, Dp // tn, Kp // tk)

    out_p = pl.pallas_call(
        functools.partial(_gcn_kernel, negative_slope=negative_slope, tk=tk,
                          emb_resident=emb_resident),
        out_shape=jax.ShapeDtypeStruct((Mp, Dp), out_dtype),
        grid_spec=pltpu.PrefetchScalarGridSpec(
            num_scalar_prefetch=0,
            grid=grid,
            in_specs=[
                pl.BlockSpec((tm, tk), lambda i, j, k: (i, k)),  # adj tile
                emb_spec,                                         # embeds
            ],
            out_specs=pl.BlockSpec((tm, tn), lambda i, j, k: (i, j)),
            scratch_shapes=[pltpu.VMEM((tm, tn), jnp.float32)],
        ),
        compiler_params=pltpu.CompilerParams(
            dimension_semantics=("parallel", "parallel", "arbitrary"),
            vmem_limit_bytes=vmem_limit,
        ),
    )(adj_c, emb_c)

    if (Mp, Dp) != (N, D):
        out_p = out_p[:N, :D]
    return out_p


def gcn_layer_ref(adj, embeds, *, negative_slope=0.1):
    z = adj.astype(jnp.float32) @ embeds.astype(jnp.float32)
    return jnp.where(z >= 0, z, negative_slope * z).astype(embeds.dtype)


if __name__ == "__main__":
    # Small-but-tile-friendly shapes: N=256 nodes, D=128 features.
    N, D = 256, 128
    LEAKY = 0.1  # args.leaky in the reference; configurable via negative_slope

    key = jax.random.PRNGKey(0)
    ka, ke = jax.random.split(key, 2)

    # Sparse-ish binary adjacency, densified (torch.spmm input), plus self-loops.
    adj = (jax.random.uniform(ka, (N, N)) < 0.05).astype(jnp.float32)
    adj = adj + jnp.eye(N, dtype=jnp.float32)
    embeds = jax.random.normal(ke, (N, D), dtype=jnp.float32)

    out = gcn_layer(adj, embeds, negative_slope=LEAKY)
    jax.block_until_ready(out)

    ref = gcn_layer_ref(adj, embeds, negative_slope=LEAKY)
    assert out.shape == (N, D)
    assert jnp.allclose(out, ref, atol=1e-3, rtol=1e-3)
    print("KERNEL_OK")
</pallas_src>

<mosaic_0001>
module attributes {stable_mosaic.version = 11 : i64} {
  func.func @_gcn_kernel(%arg0: i32, %arg1: i32, %arg2: i32, %arg3: memref<128x256xbf16, #tpu.memory_space<vmem>>, %arg4: memref<256x128xf32, #tpu.memory_space<vmem>>, %arg5: memref<128x128xf32, #tpu.memory_space<vmem>>, %arg6: memref<128x128xf32, #tpu.memory_space<vmem>>) attributes {dimension_semantics = [#tpu.dimension_semantics<parallel>, #tpu.dimension_semantics<parallel>, #tpu.dimension_semantics<arbitrary>], iteration_bounds = array<i64: 2, 1, 1>, scalar_prefetch = 0 : i64, scratch_operands = 1 : i64, tpu.core_type = #tpu.core_type<tc>, window_params = [{transform_indices = @transform_0, window_bounds = array<i64: 128, 256>}, {transform_indices = @transform_1, window_bounds = array<i64: 256, 128>}, {transform_indices = @transform_2, window_bounds = array<i64: 128, 128>}]} {
    %c0_i32 = arith.constant 0 : i32
    %0 = arith.cmpi eq, %arg2, %c0_i32 : i32
    %1 = arith.extui %0 : i1 to i32
    %c0_i32_0 = arith.constant 0 : i32
    %2 = arith.cmpi ne, %1, %c0_i32_0 : i32
    scf.if %2 {
      %cst_9 = arith.constant 0.000000e+00 : f32
      %16 = vector.broadcast %cst_9 : f32 to vector<128x128xf32>
      %c0_10 = arith.constant 0 : index
      %c0_11 = arith.constant 0 : index
      %17 = vector.load %arg6[%c0_10, %c0_11] : memref<128x128xf32, #tpu.memory_space<vmem>>, vector<128x128xf32>
      tpu.vector_store %arg6[%c0_10, %c0_11], %16 {strides = array<i32>} : memref<128x128xf32, #tpu.memory_space<vmem>>, vector<128x128xf32>,
    } else {
    }
    %c0 = arith.constant 0 : index
    %c0_1 = arith.constant 0 : index
    %3 = vector.load %arg3[%c0, %c0_1] : memref<128x256xbf16, #tpu.memory_space<vmem>>, vector<128x256xbf16>
    %4 = arith.extf %3 : vector<128x256xbf16> to vector<128x256xf32>
    %c256_i32 = arith.constant 256 : i32
    %5 = arith.muli %arg2, %c256_i32 : i32
    %6 = tpu.assume_multiple %5, 256 : i32
    %7 = arith.index_cast %6 : i32 to index
    %c0_2 = arith.constant 0 : index
    %8 = vector.load %arg4[%7, %c0_2] : memref<256x128xf32, #tpu.memory_space<vmem>>, vector<256x128xf32>
    %c0_3 = arith.constant 0 : index
    %c0_4 = arith.constant 0 : index
    %9 = vector.load %arg6[%c0_3, %c0_4] : memref<128x128xf32, #tpu.memory_space<vmem>>, vector<128x128xf32>
    %cst = arith.constant dense<0.000000e+00> : vector<128x128xf32>
    %10 = tpu.matmul %4, %8, %cst {dimension_numbers = #tpu.dot_dimension_numbers<[1], [0], [0], [1], [0, 0, 1, 1], [], []>} : vector<128x256xf32>, vector<256x128xf32>, vector<128x128xf32> -> vector<128x128xf32>
    %11 = arith.addf %9, %10 : vector<128x128xf32>
    %c0_5 = arith.constant 0 : index
    %c0_6 = arith.constant 0 : index
    %12 = vector.load %arg6[%c0_5, %c0_6] : memref<128x128xf32, #tpu.memory_space<vmem>>, vector<128x128xf32>
    tpu.vector_store %arg6[%c0_5, %c0_6], %11 {strides = array<i32>} : memref<128x128xf32, #tpu.memory_space<vmem>>, vector<128x128xf32>,
    %c0_i32_7 = arith.constant 0 : i32
    %13 = arith.cmpi eq, %arg2, %c0_i32_7 : i32
    %14 = arith.extui %13 : i1 to i32
    %c0_i32_8 = arith.constant 0 : i32
    %15 = arith.cmpi ne, %14, %c0_i32_8 : i32
    scf.if %15 {
      %c0_9 = arith.constant 0 : index
      %c0_10 = arith.constant 0 : index
      %16 = vector.load %arg6[%c0_9, %c0_10] : memref<128x128xf32, #tpu.memory_space<vmem>>, vector<128x128xf32>
      %cst_11 = arith.constant 0.000000e+00 : f32
      %17 = vector.broadcast %cst_11 : f32 to vector<128x128xf32>
      %18 = arith.cmpf oge, %16, %17 : vector<128x128xf32>
      %cst_12 = arith.constant 1.000000e-01 : f32
      %19 = vector.broadcast %cst_12 : f32 to vector<128x128xf32>
      %20 = arith.mulf %19, %16 : vector<128x128xf32>
      %21 = arith.select %18, %16, %20 : vector<128x128xi1>, vector<128x128xf32>
      %c0_13 = arith.constant 0 : index
      %c0_14 = arith.constant 0 : index
      %22 = vector.load %arg5[%c0_13, %c0_14] : memref<128x128xf32, #tpu.memory_space<vmem>>, vector<128x128xf32>
      tpu.vector_store %arg5[%c0_13, %c0_14], %21 {strides = array<i32>} : memref<128x128xf32, #tpu.memory_space<vmem>>, vector<128x128xf32>,
    } else {
    }
    return
  }
  func.func @transform_0(%arg0: i32, %arg1: i32, %arg2: i32) -> (i32, i32) {
    %c0_i32 = arith.constant 0 : i32
    return %arg0, %arg2 : i32, i32
  }
  func.func @transform_1(%arg0: i32, %arg1: i32, %arg2: i32) -> (i32, i32) {
    %c0_i32 = arith.constant 0 : i32
    %c0_i32_0 = arith.constant 0 : i32
    return %c0_i32, %arg1 : i32, i32
  }
  func.func @transform_2(%arg0: i32, %arg1: i32, %arg2: i32) -> (i32, i32) {
    %c0_i32 = arith.constant 0 : i32
    return %arg0, %arg1 : i32, i32
  }
}

</mosaic_0001>

<bundles_post_ra>
// kernel: tpu_custom_call.1
= control target key start
LH: loop header
LB: loop body
LE: loop exit
PB: predicated region body
PF: predicated region fallthrough
CT: control target
= control target key end

     0   :  { %7 = vsyncpa [#allocation4], 0  ;;  %s1369_s0 = inlined_call_operand.hbm [shape: bf16[256,256], index: 0, kind: input, shape index: {}]   ;;  %s1370_s1 = inlined_call_operand.hbm [shape: f32[256,128], index: 1, kind: input, shape index: {}]   ;;  %s1371_s2 = inlined_call_operand.hbm [shape: f32[256,128], index: 2, kind: output, shape index: {}]  }
   0x1   :  { %9 = vsyncpa [#allocation4 + $0x1], 0 }
   0x2   :  { %10 = vsyncpa [#allocation7], 0 }
   0x3   :  { %11 = vsyncpa [#allocation5], 0 }
   0x4   :  { %13 = vsyncpa [#allocation5 + $0x1], 0  ;;  %s1103_s9 = smov 0   ;;  %s1105_s10 = smov 0  }
   0x5   :  { %s1107_s11 = smov 0   ;;  %s1109_s12 = smov 0  }
   0x6   :  { %s1111_s13 = smov 0   ;;  %s1113_s14 = smov 0  }
   0x7 LB: > { %s709_s15 = sadd.s32 4294967295, %s1079_s14   ;;  %s710_s16 = sadd.s32 4294967294, %s1079_s14   ;;  %s1079_s14 = sphi %s1113_s14, %s19_s14   ;;  %s1075_s13 = sphi %s1111_s13, %s1395_s13   ;;  %s1071_s12 = sphi %s1109_s12, %s1394_s12   ;;  %s1067_s11 = sphi %s1107_s11, %s1393_s11   ;;  %s1063_s10 = sphi %s1105_s10, %s1392_s10   ;;  %s1059_s9 = sphi %s1103_s9, %s1391_s9  }
   0x8   : > { %p60_p0 = scmp.ne.s32.totalorder %s1063_s10, %s1059_s9  ;;  %p1137_p1 = scmp.eq.s32.totalorder %s709_s15, 0 }
   0x9   : > { %p1141_p2 = scmp.eq.s32.totalorder %s709_s15, 1  ;;  %p118_p3 = scmp.eq.s32.totalorder %s710_s16, 1 }
   0xa   : > { %s1376_s17 = scalar_select %p1137_p1, 1, 0 }
   0xb   : > { %s1377_s18 = scalar_select %p1141_p2, 1, 0 }
   0xc   : > { %p1147_p4 = por %p1137_p1, %p60_p0  ;;  %p711_p5 = scmp.ge.s32.totalorder %s1079_s14, 1 }
   0xd   : > { %p1152_p6 = por %p118_p3, %p60_p0  ;;  %p125_p7 = scmp.lt.s32.totalorder %s1079_s14, 3 }
   0xe   : > { %s1378_s19 = scalar_select %p1147_p4, 1, 0 }
   0xf   : > { %s1379_s20 = scalar_select %p1152_p6, 1, 0 }
  0x10   : > { %p1157_p8 = pnand %p711_p5, %p125_p7  ;;  %s1081_s22 = smov [#allocation6]  }
  0x11   : > { %s139_s23 = sshll.u32 %s1081_s22, 4  ;;  %s38_s25 = sadd.s32 1, %s1075_s13  ;;  %s140_s23 = int_to_ptr.vmem [resolvable:$true] %s139_s23 }
  0x12   : > { %s1380_s21 = scalar_select %p1157_p8, 1, 0 }
  0x13   : > { %p866_p9 = pneg %p1157_p8  ;;  %s935_s28 = scalar_lea.hbm %s1370_s1, 4096 }
  0x14   : > { %p936_p12 = scmp.ne.s32.totalorder %s1370_s1, %s935_s28  ;;  %p942_p5 = scmp.lt.u32.totalorder %s935_s28, %s1370_s1 }
  0x15   : > { %p1166_p11 = pnand %p866_p9, %p1137_p1 }
  0x17   : > { %p937_p13 = pneg %p1166_p11 }
  0x19   : > { %p938_p0 = pnand %p937_p13, %p936_p12 }
  0x1b   : > { %p939_p3 = pneg %p938_p0 }
  0x1d   : > { %p944_p7 = pnand %p942_p5, %p939_p3 }
  0x1f   : > { %947 = shalt.err (!%p944_p7)
}
  0x20   : > { %s948_s5 = scalar_lea.vmem %s140_s23, 4096  ;;  %p956_p1 = scmp.lt.s32.totalorder %s140_s23, %s140_s23 }
  0x21   : > { %p949_p9 = scmp.ne.s32.totalorder %s140_s23, %s948_s5  ;;  %p957_p4 = scmp.lt.s32.totalorder %s948_s5, %s948_s5 }
  0x23   : > { %p951_p10 = pnand %p949_p9, %p937_p13  ;;  %p958_p8 = por %p957_p4, %p956_p1 }
  0x25   : > { %p952_p6 = pneg %p951_p10 }
  0x27   : > { %p959_p2 = pnand %p958_p8, %p952_p6 }
  0x29   : > { %962 = shalt.err (!%p959_p2)
}
  0x2a   : > { %s1082_s6 = smov 128   ;;  %s1083_s7 = smov 8  }
  0x2b   : > { %869 = dma.hbm_to_vmem [thread:$0]  (!%p1166_p11), %s1370_s1, 4096, %s140_s23, [#allocation7], %s1082_s6, %s1082_s6, %s1083_s7  }
  0x2c   : > { %p40_p1 = scmp.ge.s32.totalorder %s38_s25, 2  ;;  %s47_s16 = sadd.s32 1, %s1067_s11 }
  0x2d   : > { %p54_p2 = scmp.ne.s32.totalorder %s1067_s11, %s1063_s10  ;;  %p55_p4 = scmp.eq.s32.totalorder %s1079_s14, 0 }
  0x2e   : > { %s1397_s25 = smov (%p40_p1, %s38_s25), 0  ;;  %p1383_p8 = scmp.ne.s32.totalorder %s1377_s18, 0 }
  0x2f   : > { %p1196_p6 = por %p55_p4, %p54_p2  ;;  %s42_s26 = ssub.s32 %s1075_s13, %s1397_s25 }
  0x30   : > { %p1202_p10 = por %p1383_p8, %p54_p2  ;;  %p879_p12 = scmp.lt.s32.totalorder %s1079_s14, 2 }
  0x31   : > { %p45_p11 = scmp.eq.s32.totalorder %s42_s26, 0  ;;  %s153_s23 = sand.u32 1, %s1067_s11  }
  0x32   : > { %s714_s27 = sshll.u32 %s153_s23, 7  ;;  %s728_s29 = sshll.u32 %s1075_s13, 11 }
  0x33   : > { %s1211_s28 = scalar_select %p45_p11, %s1067_s11, %s47_s16  }
  0x34   : > { %s1217_s4 = scalar_lea.hbm %s1369_s0, %s728_s29  ;;  %s157_s18 = scalar_lea.vmem [#allocation3], %s714_s27 }
  0x35   : > { %s167_s5 = sshll.u32 %s157_s18, 4  ;;  %p1223_p13 = pnand %p879_p12, %p1196_p6  ;;  %s1219_s5 = int_to_ptr.vmem [resolvable:$true] %s167_s5 }
  0x36   : > { %s1227_s15 = scalar_lea.sflag [#allocation4], %s153_s23  ;;  %s963_s16 = scalar_lea.hbm %s1217_s4, 2048 }
  0x37   : > { %p964_p0 = scmp.ne.s32.totalorder %s1217_s4, %s963_s16  ;;  %p965_p3 = pneg %p1223_p13 }
  0x38   : > { %s968_s22 = scalar_lea.hbm %s1369_s0, 4096  ;;  %p969_p9 = scmp.lt.u32.totalorder %s1217_s4, %s1369_s0 }
  0x39   : > { %p966_p5 = pnand %p965_p3, %p964_p0  ;;  %p970_p1 = scmp.lt.u32.totalorder %s968_s22, %s963_s16 }
  0x3a   : > { %p972_p4 = scmp.lt.u32.totalorder %s963_s16, %s1217_s4 }
  0x3b   : > { %p967_p7 = pneg %p966_p5  ;;  %p971_p2 = por %p970_p1, %p969_p9 }
  0x3d   : > { %p973_p6 = por %p972_p4, %p971_p2 }
  0x3f   : > { %p974_p8 = pnand %p973_p6, %p967_p7 }
  0x41   : > { %977 = shalt.err (!%p974_p8)
}
  0x42   : > { %s978_s23 = scalar_lea.vmem %s1219_s5, 2048  ;;  %s1084_s3 = smov [#allocation3]  }
  0x43   : > { %p979_p12 = scmp.ne.s32.totalorder %s1219_s5, %s978_s23  ;;  %s983_s18 = sshll.u32 %s1084_s3, 4  ;;  %s984_s18 = int_to_ptr.vmem [resolvable:$false] %s983_s18 }
  0x44   : > { %s985_s26 = scalar_lea.vmem %s984_s18, 4096  ;;  %p986_p5 = scmp.lt.s32.totalorder %s1219_s5, %s984_s18 }
  0x45   : > { %p981_p11 = pnand %p979_p12, %p965_p3  ;;  %p987_p9 = scmp.lt.s32.totalorder %s985_s26, %s978_s23 }
  0x47   : > { %p982_p0 = pneg %p981_p11  ;;  %p988_p1 = por %p987_p9, %p986_p5 }
  0x49   : > { %p989_p2 = pnand %p988_p1, %p982_p0 }
  0x4b   : > { %992 = shalt.err (!%p989_p2)
}
  0x4c   : > { %873 = dma.hbm_to_vmem [thread:$0]  (!%p1223_p13), %s1217_s4, 2048, %s1219_s5, %s1227_s15, %s1082_s6, %s1082_s6, %s1083_s7  }
  0x4d   : > { %p1386_p3 = scmp.ne.s32.totalorder %s1380_s21, 0 }
  0x4e   : > { %s1261_s16 = sand.u32 (!%p1386_p3), 1, %s1063_s10   ;;  %p1387_p7 = scmp.ne.s32.totalorder (!%p1386_p3), %s1378_s19, 0 }
  0x4f   : > { %179 = sbr.rel (%p1386_p3) target bundleno = 387 (0x183), region = 28  ;;  %s719_s27 = sshll.u32 (!%p1386_p3), %s1261_s16, 7 }
  0x50   : > { %s182_s22 = scalar_lea.sflag (!%p1386_p3), [#allocation4], %s1261_s16  ;;  %s1267_s8 = scalar_lea.vmem (!%p1386_p3), [#allocation3], %s719_s27 }
  0x56   : > { %1046 = dma.done.wait (%p1387_p7), %s182_s22, 2048  }
  0x57   : > { %1048 = vsyncadd (%p1387_p7), %s182_s22, 4294965248  ;;  %p1388_p13 = scmp.ne.s32.totalorder %s1376_s17, 0 }
  0x59   : > { %1050 = dma.done.wait (%p1388_p13), [#allocation7], 4096  }
  0x5a   : > { %1052 = vsyncadd (%p1388_p13), [#allocation7], 4294963200  ;;  %v299_v0 = vld [vmem:[#allocation6 + $0x80] sm:$0xff]  ;;  %v300_v1 = vld [vmem:[#allocation6 + $0x88] sm:$0xff]  ;;  %s1295_s17 = scalar_lea.vmem [#allocation8], %s719_s27  ;;  %s729_s19 = sshll.u32 %s1071_s12, 11 }
  0x5b   : > { %v283_v2 = vld [vmem:[#allocation6] sm:$0xff]  ;;  %v810_v3 = vpack.c.bf16 %v300_v1, %v299_v0  ;;  %v284_v4 = vld [vmem:[#allocation6 + $0x8] sm:$0xff]  ;;  %v301_v5 = vld [vmem:[#allocation6 + $0x90] sm:$0xff]  ;;  %s606_s21 = sshll.u32 %s1295_s17, 4  ;;  %s1316_s4 = scalar_lea.hbm %s1371_s2, %s729_s19  ;;  %s1318_s21 = int_to_ptr.vmem [resolvable:$true] %s606_s21 }
  0x5c   : > { %v302_v6 = vld [vmem:[#allocation6 + $0x98] sm:$0xff]  ;;  %v812_v7 = vpack.c.bf16 %v284_v4, %v283_v2  ;;  %v285_v9 = vld [vmem:[#allocation6 + $0x10] sm:$0xff]  ;;  %v303_v11 = vld [vmem:[#allocation6 + $0xa0] sm:$0xff]  ;;  %s592_s12 = scalar_lea.sflag [#allocation5], %s1261_s16  ;;  %s993_s5 = scalar_lea.vmem %s1318_s21, 2048 }
  0x5d   : > { %v814_v8 = vpack.c.bf16 %v302_v6, %v301_v5  ;;  %v286_v10 = vld [vmem:[#allocation6 + $0x18] sm:$0xff]  ;;  %811 = vmatprep.subr.bf16.mxu0 %v810_v3  ;;  %842 = vmatprep.subr.bf16.mxu1 %v810_v3  ;;  %v304_v12 = vld [vmem:[#allocation6 + $0xa8] sm:$0xff]  ;;  %v287_v15 = vld [vmem:[#allocation6 + $0x20] sm:$0xff]  ;;  %p994_p4 = scmp.ne.s32.totalorder %s1318_s21, %s993_s5  ;;  %s1085_s15 = smov [#allocation8]  }
  0x5e   : > { %813 = vmatpush3.bf16.msra.mxu0 %v812_v7  ;;  %850 = vmatpush3.bf16.msra.mxu1 %v812_v7  ;;  %v816_v13 = vpack.c.bf16 %v286_v10, %v285_v9  ;;  %v818_v14 = vpack.c.bf16 %v304_v12, %v303_v11  ;;  %v288_v16 = vld [vmem:[#allocation6 + $0x28] sm:$0xff]  ;;  %v305_v17 = vld [vmem:[#allocation6 + $0xb0] sm:$0xff]  ;;  %v306_v18 = vld [vmem:[#allocation6 + $0xb8] sm:$0xff]  ;;  %s997_s29 = sshll.u32 %s1085_s15, 4  ;;  %s998_s29 = int_to_ptr.vmem [resolvable:$false] %s997_s29 }
  0x5f   : > { %815 = vmatprep.subr.bf16.mxu0 %v814_v8  ;;  %843 = vmatprep.subr.bf16.mxu1 %v814_v8  ;;  %v820_v19 = vpack.c.bf16 %v288_v16, %v287_v15  ;;  %v822_v20 = vpack.c.bf16 %v306_v18, %v305_v17  ;;  %v289_v21 = vld [vmem:[#allocation6 + $0x30] sm:$0xff]  ;;  %v290_v22 = vld [vmem:[#allocation6 + $0x38] sm:$0xff]  ;;  %v307_v23 = vld [vmem:[#allocation6 + $0xc0] sm:$0xff]  ;;  %p995_p6 = pnand %p994_p4, %p1202_p10  ;;  %s999_s30 = scalar_lea.vmem %s998_s29, 4096 }
  0x60   : > { %v308_v24 = vld [vmem:[#allocation6 + $0xc8] sm:$0xff]  ;;  %v233_v25 = vld [vmem:[%s1267_s8] sm:$0xff]  ;;  %v824_v28 = vpack.c.bf16 %v290_v22, %v289_v21  ;;  %v309_v33 = vld [vmem:[#allocation6 + $0xd0] sm:$0xff]  ;;  %p1000_p12 = scmp.lt.s32.totalorder %s1318_s21, %s998_s29  ;;  %p1001_p11 = scmp.lt.s32.totalorder %s999_s30, %s993_s5 }
  0x61   : > { %v250_v26 = vunpack.c.h.bf16 %v233_v25  ;;  %v241_v27 = vld [vmem:[%s1267_s8 + $0x40] sm:$0xff]  ;;  %v826_v30 = vpack.c.bf16 %v308_v24, %v307_v23  ;;  %v292_v32 = vld [vmem:[#allocation6 + $0x48] sm:$0xff]  ;;  %v310_v34 = vld [vmem:[#allocation6 + $0xd8] sm:$0xff]  ;;  %v249_v54 = vunpack.c.l.bf16 %v233_v25  ;;  %p996_p8 = pneg %p995_p6 }
  0x62   : > { %817 = vmatpush3.bf16.msra.mxu0 %v816_v13  ;;  %851 = vmatpush3.bf16.msra.mxu1 %v816_v13  ;;  %v266_v29 = vunpack.c.h.bf16 %v241_v27  ;;  %v291_v31 = vld [vmem:[#allocation6 + $0x40] sm:$0xff]  ;;  %v830_v36 = vpack.c.bf16 %v310_v34, %v309_v33  ;;  %v293_v37 = vld [vmem:[#allocation6 + $0x50] sm:$0xff]  ;;  %v294_v38 = vld [vmem:[#allocation6 + $0x58] sm:$0xff]  ;;  %v265_v55 = vunpack.c.l.bf16 %v241_v27  ;;  %p1002_p0 = por %p1001_p11, %p1000_p12 }
  0x63   : > { %819 = vmatprep.subr.bf16.mxu0 %v818_v14  ;;  %844 = vmatprep.subr.bf16.mxu1 %v818_v14  ;;  %v828_v35 = vpack.c.bf16 %v292_v32, %v291_v31  ;;  %v311_v39 = vld [vmem:[#allocation6 + $0xe0] sm:$0xff]  ;;  %v312_v40 = vld [vmem:[#allocation6 + $0xe8] sm:$0xff]  ;;  %v832_v41 = vpack.c.bf16 %v294_v38, %v293_v37  ;;  %v313_v45 = vld [vmem:[#allocation6 + $0xf0] sm:$0xff] }
  0x64   : > { %395 = vmatprep.mubr.f32.mxu0 %v250_v26  ;;  %435 = vmatprep.mubr.f32.mxu1 %v266_v29  ;;  %v834_v42 = vpack.c.bf16 %v312_v40, %v311_v39  ;;  %v295_v43 = vld [vmem:[#allocation6 + $0x60] sm:$0xff]  ;;  %v296_v44 = vld [vmem:[#allocation6 + $0x68] sm:$0xff]  ;;  %v314_v46 = vld [vmem:[#allocation6 + $0xf8] sm:$0xff]  ;;  %p1003_p5 = pnand %p1002_p0, %p996_p8 }
  0x65   : > { %v836_v47 = vpack.c.bf16 %v296_v44, %v295_v43  ;;  %v838_v48 = vpack.c.bf16 %v314_v46, %v313_v45  ;;  %v297_v49 = vld [vmem:[#allocation6 + $0x70] sm:$0xff]  ;;  %v298_v50 = vld [vmem:[#allocation6 + $0x78] sm:$0xff]  ;;  %v234_v52 = vld [vmem:[%s1267_s8 + $0x8] sm:$0xff] }
  0x66   : > { %821 = vmatpush3.bf16.msra.mxu0 %v820_v19  ;;  %852 = vmatpush3.bf16.msra.mxu1 %v820_v19  ;;  %v840_v51 = vpack.c.bf16 %v298_v50, %v297_v49  ;;  %v242_v53 = vld [vmem:[%s1267_s8 + $0x48] sm:$0xff]  ;;  %v252_v56 = vunpack.c.h.bf16 %v234_v52  ;;  %v235_v58 = vld [vmem:[%s1267_s8 + $0x10] sm:$0xff]  ;;  %v251_v60 = vunpack.c.l.bf16 %v234_v52  ;;  %v236_v0 = vld [vmem:[%s1267_s8 + $0x18] sm:$0xff] }
  0x67   : > { %823 = vmatprep.subr.bf16.mxu0 %v822_v20  ;;  %845 = vmatprep.subr.bf16.mxu1 %v822_v20  ;;  %v268_v57 = vunpack.c.h.bf16 %v242_v53  ;;  %v243_v59 = vld [vmem:[%s1267_s8 + $0x50] sm:$0xff]  ;;  %v267_v61 = vunpack.c.l.bf16 %v242_v53  ;;  %v254_v62 = vunpack.c.h.bf16 %v235_v58  ;;  %v244_v1 = vld [vmem:[%s1267_s8 + $0x58] sm:$0xff]  ;;  %v253_v2 = vunpack.c.l.bf16 %v235_v58  ;;  %v237_v6 = vld [vmem:[%s1267_s8 + $0x20] sm:$0xff] }
  0x68   : > { %v270_v63 = vunpack.c.h.bf16 %v243_v59  ;;  %v269_v3 = vunpack.c.l.bf16 %v243_v59  ;;  %v256_v4 = vunpack.c.h.bf16 %v236_v0  ;;  %v272_v5 = vunpack.c.h.bf16 %v244_v1  ;;  %v245_v7 = vld [vmem:[%s1267_s8 + $0x60] sm:$0xff]  ;;  %v238_v12 = vld [vmem:[%s1267_s8 + $0x28] sm:$0xff]  ;;  %v239_v18 = vld [vmem:[%s1267_s8 + $0x30] sm:$0xff] }
  0x69   : > { %v255_v8 = vunpack.c.l.bf16 %v236_v0  ;;  %v271_v9 = vunpack.c.l.bf16 %v244_v1  ;;  %v258_v10 = vunpack.c.h.bf16 %v237_v6  ;;  %v274_v11 = vunpack.c.h.bf16 %v245_v7  ;;  %v246_v13 = vld [vmem:[%s1267_s8 + $0x68] sm:$0xff]  ;;  %v247_v19 = vld [vmem:[%s1267_s8 + $0x70] sm:$0xff]  ;;  %v240_v24 = vld [vmem:[%s1267_s8 + $0x38] sm:$0xff] }
  0x6a   : > { %825 = vmatpush3.bf16.msra.mxu0 %v824_v28  ;;  %853 = vmatpush3.bf16.msra.mxu1 %v824_v28  ;;  %v257_v14 = vunpack.c.l.bf16 %v237_v6  ;;  %v273_v15 = vunpack.c.l.bf16 %v245_v7  ;;  %v260_v16 = vunpack.c.h.bf16 %v238_v12  ;;  %v276_v17 = vunpack.c.h.bf16 %v246_v13  ;;  %v248_v25 = vld [vmem:[%s1267_s8 + $0x78] sm:$0xff] }
  0x6b   : > { %827 = vmatprep.subr.bf16.mxu0 %v826_v30  ;;  %846 = vmatprep.subr.bf16.mxu1 %v826_v30  ;;  %v259_v20 = vunpack.c.l.bf16 %v238_v12  ;;  %v275_v21 = vunpack.c.l.bf16 %v246_v13  ;;  %v262_v22 = vunpack.c.h.bf16 %v239_v18  ;;  %v278_v23 = vunpack.c.h.bf16 %v247_v19 }
  0x6c   : > { %v261_v26 = vunpack.c.l.bf16 %v239_v18  ;;  %v277_v27 = vunpack.c.l.bf16 %v247_v19  ;;  %v264_v28 = vunpack.c.h.bf16 %v240_v24  ;;  %v280_v29 = vunpack.c.h.bf16 %v248_v25 }
  0x6d   : > { %v263_v30 = vunpack.c.l.bf16 %v240_v24  ;;  %v279_v31 = vunpack.c.l.bf16 %v248_v25 }
  0x6e   : > { %829 = vmatpush3.bf16.msra.mxu0 %v828_v35  ;;  %854 = vmatpush3.bf16.msra.mxu1 %v828_v35 }
  0x6f   : > { %831 = vmatprep.subr.bf16.mxu0 %v830_v36  ;;  %847 = vmatprep.subr.bf16.mxu1 %v830_v36 }
  0x72   : > { %833 = vmatpush3.bf16.msra.mxu0 %v832_v41  ;;  %855 = vmatpush3.bf16.msra.mxu1 %v832_v41 }
  0x73   : > { %835 = vmatprep.subr.bf16.mxu0 %v834_v42  ;;  %848 = vmatprep.subr.bf16.mxu1 %v834_v42 }
  0x76   : > { %837 = vmatpush3.bf16.msra.mxu0 %v836_v47  ;;  %856 = vmatpush3.bf16.msra.mxu1 %v836_v47 }
  0x77   : > { %839 = vmatprep.subr.bf16.mxu0 %v838_v48  ;;  %849 = vmatprep.subr.bf16.mxu1 %v838_v48 }
  0x7a   : > { %841 = vmatpush3.bf16.msra.mxu0 %v840_v51  ;;  %857 = vmatpush3.bf16.msra.mxu1 %v840_v51 }
  0x7d   : > { %396 = vmatmul.mubr.f32.vlgmr.msra.gmra.mrb[0].mxu0 %v249_v54  ;;  %436 = vmatmul.mubr.f32.vlgmr.msra.gmra.mrb[0].mxu1 %v265_v55 }
  0x7e   : > { %400 = vmatprep.mubr.f32.mxu0 %v252_v56  ;;  %440 = vmatprep.mubr.f32.mxu1 %v268_v57 }
  0x81   : > { %401 = vmatmul.mubr.f32.gmra.mrb[2].mxu0 %v251_v60  ;;  %441 = vmatmul.mubr.f32.gmra.mrb[2].mxu1 %v267_v61 }
  0x82   : > { %405 = vmatprep.mubr.f32.mxu0 %v254_v62  ;;  %445 = vmatprep.mubr.f32.mxu1 %v270_v63 }
  0x85   : > { %406 = vmatmul.mubr.f32.gmra.mrb[4].mxu0 %v253_v2  ;;  %446 = vmatmul.mubr.f32.gmra.mrb[4].mxu1 %v269_v3 }
  0x86   : > { %410 = vmatprep.mubr.f32.mxu0 %v256_v4  ;;  %450 = vmatprep.mubr.f32.mxu1 %v272_v5 }
  0x89   : > { %411 = vmatmul.mubr.f32.gmra.mrb[6].mxu0 %v255_v8  ;;  %451 = vmatmul.mubr.f32.gmra.mrb[6].mxu1 %v271_v9 }
  0x8a   : > { %415 = vmatprep.mubr.f32.mxu0 %v258_v10  ;;  %455 = vmatprep.mubr.f32.mxu1 %v274_v11 }
  0x8d   : > { %416 = vmatmul.mubr.f32.gmra.mrb[8].mxu0 %v257_v14  ;;  %456 = vmatmul.mubr.f32.gmra.mrb[8].mxu1 %v273_v15 }
  0x8e   : > { %420 = vmatprep.mubr.f32.mxu0 %v260_v16  ;;  %460 = vmatprep.mubr.f32.mxu1 %v276_v17 }
  0x91   : > { %421 = vmatmul.mubr.f32.gmra.mrb[10].mxu0 %v259_v20  ;;  %461 = vmatmul.mubr.f32.gmra.mrb[10].mxu1 %v275_v21 }
  0x92   : > { %425 = vmatprep.mubr.f32.mxu0 %v262_v22  ;;  %465 = vmatprep.mubr.f32.mxu1 %v278_v23 }
  0x95   : > { %426 = vmatmul.mubr.f32.gmra.mrb[12].mxu0 %v261_v26  ;;  %466 = vmatmul.mubr.f32.gmra.mrb[12].mxu1 %v277_v27 }
  0x96   : > { %430 = vmatprep.mubr.f32.mxu0 %v264_v28  ;;  %470 = vmatprep.mubr.f32.mxu1 %v280_v29 }
  0x99   : > { %431 = vmatmul.mubr.f32.gmra.mrb[14].mxu0 %v263_v30  ;;  %471 = vmatmul.mubr.f32.gmra.mrb[14].mxu1 %v279_v31 }
 0x150   : > { %v762_v32 = vpop.f32.mrb[0].mxu0  ;;  %v786_v33 = vpop.f32.mrb[0].mxu1 }
 0x151   : > { %v763_v34 = vpop.f32.mrb[1].mxu0  ;;  %v787_v35 = vpop.f32.mrb[1].mxu1 }
 0x152   : > { %v764_v36 = vadd.f32 %v763_v34, %v762_v32  ;;  %v788_v37 = vadd.f32 %v787_v35, %v786_v33 }
 0x154   : > { %vm527_vm0 = vcmp.ge.f32.partialorder %v764_v36, 0.0  ;;  %v543_v38 = vmul.f32 0.1, %v764_v36  ;;  %vm535_vm1 = vcmp.ge.f32.partialorder %v788_v37, 0.0  ;;  %v551_v39 = vmul.f32 0.1, %v788_v37 }
 0x155   : > { %v765_v40 = vpop.f32.mrb[2].mxu0  ;;  %v789_v41 = vpop.f32.mrb[2].mxu1 }
 0x156   : > { %v559_v42 = vsel %vm527_vm0, %v764_v36, %v543_v38  ;;  %v567_v43 = vsel %vm535_vm1, %v788_v37, %v551_v39  ;;  %v766_v44 = vpop.f32.mrb[3].mxu0  ;;  %v790_v45 = vpop.f32.mrb[3].mxu1 }
 0x157   : > { %575 = vst [vmem:[%s1295_s17] sm:$0xff] %v559_v42  ;;  %583 = vst [vmem:[%s1295_s17 + $0x40] sm:$0xff] %v567_v43  ;;  %v767_v46 = vadd.f32 %v766_v44, %v765_v40  ;;  %v791_v47 = vadd.f32 %v790_v45, %v789_v41 }
 0x158   : > { %v768_v48 = vpop.f32.mrb[4].mxu0  ;;  %v792_v49 = vpop.f32.mrb[4].mxu1 }
 0x159   : > { %vm528_vm2 = vcmp.ge.f32.partialorder %v767_v46, 0.0  ;;  %v544_v50 = vmul.f32 0.1, %v767_v46  ;;  %vm536_vm3 = vcmp.ge.f32.partialorder %v791_v47, 0.0  ;;  %v552_v51 = vmul.f32 0.1, %v791_v47 }
 0x15a   : > { %v769_v52 = vpop.f32.mrb[5].mxu0  ;;  %v793_v53 = vpop.f32.mrb[5].mxu1 }
 0x15b   : > { %v560_v54 = vsel %vm528_vm2, %v767_v46, %v544_v50  ;;  %v568_v55 = vsel %vm536_vm3, %v791_v47, %v552_v51  ;;  %v770_v56 = vadd.f32 %v769_v52, %v768_v48  ;;  %v794_v57 = vadd.f32 %v793_v53, %v792_v49 }
 0x15c   : > { %576 = vst [vmem:[%s1295_s17 + $0x8] sm:$0xff] %v560_v54  ;;  %584 = vst [vmem:[%s1295_s17 + $0x48] sm:$0xff] %v568_v55  ;;  %v771_v58 = vpop.f32.mrb[6].mxu0  ;;  %v795_v59 = vpop.f32.mrb[6].mxu1 }
 0x15d   : > { %vm529_vm4 = vcmp.ge.f32.partialorder %v770_v56, 0.0  ;;  %v545_v60 = vmul.f32 0.1, %v770_v56  ;;  %vm537_vm5 = vcmp.ge.f32.partialorder %v794_v57, 0.0  ;;  %v553_v61 = vmul.f32 0.1, %v794_v57 }
 0x15e   : > { %v772_v62 = vpop.f32.mrb[7].mxu0  ;;  %v796_v63 = vpop.f32.mrb[7].mxu1 }
 0x15f   : > { %v561_v0 = vsel %vm529_vm4, %v770_v56, %v545_v60  ;;  %v569_v1 = vsel %vm537_vm5, %v794_v57, %v553_v61  ;;  %v773_v2 = vadd.f32 %v772_v62, %v771_v58  ;;  %v797_v3 = vadd.f32 %v796_v63, %v795_v59 }
 0x160   : > { %577 = vst [vmem:[%s1295_s17 + $0x10] sm:$0xff] %v561_v0  ;;  %585 = vst [vmem:[%s1295_s17 + $0x50] sm:$0xff] %v569_v1  ;;  %v774_v4 = vpop.f32.mrb[8].mxu0  ;;  %v798_v5 = vpop.f32.mrb[8].mxu1 }
 0x161   : > { %vm530_vm6 = vcmp.ge.f32.partialorder %v773_v2, 0.0  ;;  %v546_v6 = vmul.f32 0.1, %v773_v2  ;;  %vm538_vm7 = vcmp.ge.f32.partialorder %v797_v3, 0.0  ;;  %v554_v7 = vmul.f32 0.1, %v797_v3 }
 0x162   : > { %v775_v8 = vpop.f32.mrb[9].mxu0  ;;  %v799_v9 = vpop.f32.mrb[9].mxu1 }
 0x163   : > { %v562_v10 = vsel %vm530_vm6, %v773_v2, %v546_v6  ;;  %v570_v11 = vsel %vm538_vm7, %v797_v3, %v554_v7  ;;  %v776_v12 = vadd.f32 %v775_v8, %v774_v4  ;;  %v800_v13 = vadd.f32 %v799_v9, %v798_v5 }
 0x164   : > { %578 = vst [vmem:[%s1295_s17 + $0x18] sm:$0xff] %v562_v10  ;;  %586 = vst [vmem:[%s1295_s17 + $0x58] sm:$0xff] %v570_v11  ;;  %v777_v14 = vpop.f32.mrb[10].mxu0  ;;  %v801_v15 = vpop.f32.mrb[10].mxu1 }
 0x165   : > { %vm531_vm8 = vcmp.ge.f32.partialorder %v776_v12, 0.0  ;;  %v547_v16 = vmul.f32 0.1, %v776_v12  ;;  %vm539_vm9 = vcmp.ge.f32.partialorder %v800_v13, 0.0  ;;  %v555_v17 = vmul.f32 0.1, %v800_v13 }
 0x166   : > { %v778_v18 = vpop.f32.mrb[11].mxu0  ;;  %v802_v19 = vpop.f32.mrb[11].mxu1 }
 0x167   : > { %v563_v20 = vsel %vm531_vm8, %v776_v12, %v547_v16  ;;  %v571_v21 = vsel %vm539_vm9, %v800_v13, %v555_v17  ;;  %v779_v22 = vadd.f32 %v778_v18, %v777_v14  ;;  %v803_v23 = vadd.f32 %v802_v19, %v801_v15 }
 0x168   : > { %579 = vst [vmem:[%s1295_s17 + $0x20] sm:$0xff] %v563_v20  ;;  %587 = vst [vmem:[%s1295_s17 + $0x60] sm:$0xff] %v571_v21  ;;  %v780_v24 = vpop.f32.mrb[12].mxu0  ;;  %v804_v25 = vpop.f32.mrb[12].mxu1 }
 0x169   : > { %vm532_vm10 = vcmp.ge.f32.partialorder %v779_v22, 0.0  ;;  %v548_v26 = vmul.f32 0.1, %v779_v22  ;;  %vm540_vm11 = vcmp.ge.f32.partialorder %v803_v23, 0.0  ;;  %v556_v27 = vmul.f32 0.1, %v803_v23 }
 0x16a   : > { %v781_v28 = vpop.f32.mrb[13].mxu0  ;;  %v805_v29 = vpop.f32.mrb[13].mxu1 }
 0x16b   : > { %v564_v30 = vsel %vm532_vm10, %v779_v22, %v548_v26  ;;  %v572_v31 = vsel %vm540_vm11, %v803_v23, %v556_v27  ;;  %v782_v32 = vadd.f32 %v781_v28, %v780_v24  ;;  %v806_v33 = vadd.f32 %v805_v29, %v804_v25 }
 0x16c   : > { %580 = vst [vmem:[%s1295_s17 + $0x28] sm:$0xff] %v564_v30  ;;  %588 = vst [vmem:[%s1295_s17 + $0x68] sm:$0xff] %v572_v31  ;;  %v783_v34 = vpop.f32.mrb[14].mxu0  ;;  %v807_v35 = vpop.f32.mrb[14].mxu1 }
 0x16d   : > { %vm533_vm12 = vcmp.ge.f32.partialorder %v782_v32, 0.0  ;;  %v549_v36 = vmul.f32 0.1, %v782_v32  ;;  %vm541_vm13 = vcmp.ge.f32.partialorder %v806_v33, 0.0  ;;  %v557_v37 = vmul.f32 0.1, %v806_v33 }
 0x16e   : > { %v784_v38 = vpop.f32.mrb[15].mxu0  ;;  %v808_v39 = vpop.f32.mrb[15].mxu1 }
 0x16f   : > { %v565_v40 = vsel %vm533_vm12, %v782_v32, %v549_v36  ;;  %v573_v41 = vsel %vm541_vm13, %v806_v33, %v557_v37  ;;  %v785_v42 = vadd.f32 %v784_v38, %v783_v34  ;;  %v809_v43 = vadd.f32 %v808_v39, %v807_v35 }
 0x170   : > { %581 = vst [vmem:[%s1295_s17 + $0x30] sm:$0xff] %v565_v40  ;;  %589 = vst [vmem:[%s1295_s17 + $0x70] sm:$0xff] %v573_v41 }
 0x171   : > { %vm534_vm14 = vcmp.ge.f32.partialorder %v785_v42, 0.0  ;;  %v550_v44 = vmul.f32 0.1, %v785_v42  ;;  %vm542_vm15 = vcmp.ge.f32.partialorder %v809_v43, 0.0  ;;  %v558_v45 = vmul.f32 0.1, %v809_v43 }
 0x173   : > { %v566_v46 = vsel %vm534_vm14, %v785_v42, %v550_v44  ;;  %v574_v47 = vsel %vm542_vm15, %v809_v43, %v558_v45 }
 0x174   : > { %582 = vst [vmem:[%s1295_s17 + $0x38] sm:$0xff] %v566_v46  ;;  %590 = vst [vmem:[%s1295_s17 + $0x78] sm:$0xff] %v574_v47 }
 0x175   : > { %1006 = shalt.err (!%p1003_p5)
}
 0x176   : > { %s1007_s23 = scalar_lea.hbm %s1316_s4, 2048  ;;  %s1011_s26 = scalar_lea.hbm %s1371_s2, 4096 }
 0x177   : > { %p1008_p9 = scmp.ne.s32.totalorder %s1316_s4, %s1007_s23  ;;  %p1012_p3 = scmp.lt.u32.totalorder %s1316_s4, %s1371_s2 }
 0x178   : > { %p1013_p7 = scmp.lt.u32.totalorder %s1011_s26, %s1007_s23  ;;  %p1015_p4 = scmp.lt.u32.totalorder %s1007_s23, %s1316_s4 }
 0x179   : > { %p1009_p1 = pnand %p1008_p9, %p1202_p10 }
 0x17a   : > { %p1014_p13 = por %p1013_p7, %p1012_p3 }
 0x17b   : > { %p1010_p2 = pneg %p1009_p1 }
 0x17c   : > { %p1016_p6 = por %p1015_p4, %p1014_p13 }
 0x17e   : > { %p1017_p8 = pnand %p1016_p6, %p1010_p2 }
 0x180   : > { %1020 = shalt.err (!%p1017_p8)
}
 0x181   : > { %s1086_s8 = smov 128   ;;  %s1087_s17 = smov 8  }
 0x182   : > { %864 = dma.vmem_to_hbm [thread:$0]  (%p1202_p10), %s1318_s21, 2048, %s1316_s4, %s592_s12, %s1086_s8, %s1086_s8, %s1087_s17  }
 0x183 PF: > { %s621_s19 = sand.u32 1, %s1059_s9   ;;  %p1389_p12 = scmp.ne.s32.totalorder %s1379_s20, 0 }
 0x184   : > { %p1390_p11 = scmp.ge.s32.totalorder %s1079_s14, 2  ;;  %s622_s6 = scalar_lea.sflag [#allocation5], %s621_s19 }
 0x186   : > { %p875_p0 = pnand %p1390_p11, %p1389_p12 }
 0x188   : > { %1054 = dma.done.wait (!%p875_p0), %s622_s6, 2048  }
 0x189   : > { %1056 = vsyncadd (!%p875_p0), %s622_s6, 4294965248  ;;  %s19_s14 = sadd.s32 1, %s1079_s14   ;;  %s1391_s9 = smov %s1063_s10 }
 0x18a   : > { %p16_p5 = scmp.ge.s32.totalorder %s19_s14, 4   ;;  %s1392_s10 = smov %s1067_s11 }
 0x18b   : > { %s1393_s11 = smov %s1211_s28  ;;  %s1394_s12 = smov %s1075_s13 }
 0x18c   : > { %s1395_s13 = smov %s1397_s25  ;;  %18 = sbr.rel (!%p16_p5) target bundleno = 7 (0x7), region = 87 }
 0x193   :  { %627 = vsyncpa [#allocation4], 1 }
 0x194   :  { %629 = vsyncpa [#allocation4 + $0x1], 1 }
 0x195   :  { %630 = vsyncpa [#allocation7], 1 }
 0x196   :  { %631 = vsyncpa [#allocation5], 1 }
 0x197   :  { %633 = vsyncpa [#allocation5 + $0x1], 1 }

</bundles_post_ra>
